<compile_context>
chip_gen: v7x
topology: tpu7x:2x2x1
jax: 0.10.0
libtpu: 0.0.40
codegen_flags: <defaults>
</compile_context>

<pallas_src>
import functools

import jax
import jax.numpy as jnp
from jax import lax
from jax.experimental import pallas as pl
from jax.experimental.pallas import tpu as pltpu


def _fused_dsconv_bn_relu_kernel(x_ref, wd_ref, wp_ref, bp_ref, g_ref, b_ref,
                                 o_ref, *, N, C, O, W, KH, KW, Ho, Wo, cnt, eps):
    """Fused depthwise conv + pointwise 1x1 conv + BatchNorm(train) + ReLU.

    x_ref : (N*C, Lp)     input; (batch, channel) packed on sublanes, H*W flat on lanes
    wd_ref: (N*C, KH*KW)  depthwise taps, tiled over batch
    wp_ref: (O, C)        pointwise weights (transposed)
    bp_ref: (O, 1)        folded bias (depthwise bias pushed through pointwise + pw bias)
    g_ref : (O, 1)        BN gamma
    b_ref : (O, 1)        BN beta
    o_ref : (N, O, Lp)    output; flat positions q = oh*W + ow; columns with oh >= Ho or
                          ow >= Wo are junk (masked from stats, cropped in the wrapper)
    """
    Lp = x_ref.shape[1]

    x = x_ref[...].astype(jnp.float32)        # (N*C, Lp)
    wd = wd_ref[...].astype(jnp.float32)      # (N*C, KH*KW)
    wp = wp_ref[...].astype(jnp.float32)      # (O, C)
    bp = bp_ref[...].astype(jnp.float32)      # (O, 1)

    # --- depthwise conv: circular-roll taps (XLU) + VPU FMAs on the packed slab.
    # Max read offset for a valid output is (H-1)*W + (W-1) = H*W - 1 < Lp, so the
    # wrap-around never touches a valid output position.
    acc = x * wd[:, 0:1]                                        # tap (0, 0): shift 0
    for kh in range(KH):
        for kw in range(KW):
            s = kh * W + kw
            if s == 0:
                continue
            xs = pltpu.roll(x, shift=Lp - s, axis=1)            # out[q] = x[(q+s) % Lp]
            acc = acc + xs * wd[:, kh * KW + kw:kh * KW + kw + 1]

    # --- in-kernel validity mask over flat output positions.
    q = lax.broadcasted_iota(jnp.int32, (1, Lp), 1)
    m = ((q < Ho * W) & (q % W < Wo)).astype(jnp.float32)       # (1, Lp)

    # --- pointwise 1x1 conv (unrolled VPU broadcast-FMAs; C=4 too small for the MXU)
    #     with single-pass masked batch statistics.
    zs = []
    s1 = jnp.zeros((O, 1), jnp.float32)
    s2 = jnp.zeros((O, 1), jnp.float32)
    for n in range(N):
        zn = bp + acc[n * C:n * C + 1, :] * wp[:, 0:1]          # (O, Lp)
        for c in range(1, C):
            zn = zn + acc[n * C + c:n * C + c + 1, :] * wp[:, c:c + 1]
        zs.append(zn)
        zv = zn * m
        s1 = s1 + jnp.sum(zv, axis=1, keepdims=True)            # (O, 1)
        s2 = s2 + jnp.sum(zv * zv, axis=1, keepdims=True)       # (O, 1)

    # --- BatchNorm2d (training-mode biased variance) folded to one scale/shift + ReLU.
    inv_cnt = 1.0 / cnt
    mean = s1 * inv_cnt
    var = s2 * inv_cnt - mean * mean
    inv = lax.rsqrt(var + eps)
    scale = g_ref[...].astype(jnp.float32) * inv                # (O, 1)
    shift = b_ref[...].astype(jnp.float32) - mean * scale       # (O, 1)
    for n in range(N):
        o_ref[n] = jnp.maximum(zs[n] * scale + shift, 0.0).astype(o_ref.dtype)


def depth_separable_conv2d(x_nchw, wd, bd, wp, bp, gamma, beta, eps=1e-5):
    """x_nchw: (N, C, H, W) f32.  Returns (N, O, Ho, Wo) f32 (same NCHW layout as PyTorch)."""
    N, C, H, W = x_nchw.shape
    KH, KW, _ = wd.shape
    O = wp.shape[1]
    Ho, Wo = H - KH + 1, W - KW + 1
    HW = H * W
    Lp = pl.cdiv(HW, 128) * 128            # lane-dense width (== HW for 16x16: no padding)
    cnt = N * Ho * Wo

    # Pack (batch, channel) onto sublanes, flatten spatial onto lanes (free reshape).
    x_p = x_nchw.reshape(N * C, HW)
    if Lp != HW:
        x_p = jnp.pad(x_p, ((0, 0), (0, Lp - HW)))

    # Kernel-friendly parameter layouts; fold the depthwise bias into the pointwise bias.
    wd_k = jnp.tile(wd.reshape(KH * KW, C).T, (N, 1))            # (N*C, KH*KW)
    wp_k = wp.T                                                  # (O, C)
    bp_k = (bd @ wp + bp).reshape(O, 1)                          # (O, 1)
    g_k = gamma.reshape(O, 1)                                    # (O, 1)
    b_k = beta.reshape(O, 1)                                     # (O, 1)

    kernel = functools.partial(_fused_dsconv_bn_relu_kernel,
                               N=N, C=C, O=O, W=W, KH=KH, KW=KW,
                               Ho=Ho, Wo=Wo, cnt=cnt, eps=eps)

    z = pl.pallas_call(
        kernel,
        out_shape=jax.ShapeDtypeStruct((N, O, Lp), jnp.float32),
    )(x_p, wd_k, wp_k, bp_k, g_k, b_k)

    # (N, O, H*W) -> (N, O, H, W) is a free row-major reshape; crop to the valid window.
    return z[..., :HW].reshape(N, O, H, W)[:, :, :Ho, :Wo]


def _reference(x_nchw, wd, bd, wp, bp, gamma, beta, eps=1e-5):
    """Pure-JAX reference matching the PyTorch forward (training-mode BN)."""
    C = x_nchw.shape[1]
    w_dw = jnp.transpose(wd, (2, 0, 1))[:, None, :, :]           # (C, 1, KH, KW)
    y = lax.conv_general_dilated(x_nchw, w_dw, (1, 1), 'VALID',
                                 dimension_numbers=('NCHW', 'OIHW', 'NCHW'),
                                 feature_group_count=C)
    y = y + bd.reshape(1, C, 1, 1)
    w_pw = jnp.transpose(wp, (1, 0))[:, :, None, None]           # (O, C, 1, 1)
    z = lax.conv_general_dilated(y, w_pw, (1, 1), 'VALID',
                                 dimension_numbers=('NCHW', 'OIHW', 'NCHW'))
    z = z + bp.reshape(1, -1, 1, 1)
    mean = jnp.mean(z, axis=(0, 2, 3), keepdims=True)
    var = jnp.mean((z - mean) ** 2, axis=(0, 2, 3), keepdims=True)
    zn = (z - mean) * lax.rsqrt(var + eps)
    out = zn * gamma.reshape(1, -1, 1, 1) + beta.reshape(1, -1, 1, 1)
    return jnp.maximum(out, 0.0)


if __name__ == "__main__":
    # Small shapes consistent with the module: batch=2, C_in=4, C_out=8, k=3, 16x16 spatial.
    N, C, H, W = 2, 4, 16, 16
    O, K = 8, 3

    key = jax.random.PRNGKey(0)
    kx, k1, k2, k3, k4, k5, k6 = jax.random.split(key, 7)

    x = jax.random.normal(kx, (N, C, H, W), jnp.float32)

    # Deterministic parameter init (PyTorch-like uniform bounds; synthetic, not a checkpoint).
    b_dw = 1.0 / (K * K) ** 0.5
    wd = jax.random.uniform(k1, (K, K, C), jnp.float32, -b_dw, b_dw)   # depthwise weights
    bd = jax.random.uniform(k2, (1, C), jnp.float32, -b_dw, b_dw)      # depthwise bias
    b_pw = 1.0 / C ** 0.5
    wp = jax.random.uniform(k3, (C, O), jnp.float32, -b_pw, b_pw)      # pointwise weights
    bp = jax.random.uniform(k4, (1, O), jnp.float32, -b_pw, b_pw)      # pointwise bias
    gamma = jax.random.uniform(k5, (1, O), jnp.float32, 0.5, 1.5)      # BN weight
    beta = jax.random.uniform(k6, (1, O), jnp.float32, -0.5, 0.5)      # BN bias

    out = depth_separable_conv2d(x, wd, bd, wp, bp, gamma, beta)
    out = jax.block_until_ready(out)

    ref = _reference(x, wd, bd, wp, bp, gamma, beta)
    assert out.shape == (N, O, H - K + 1, W - K + 1), out.shape
    err = float(jnp.max(jnp.abs(out - ref)))
    assert jnp.allclose(out, ref, atol=1e-4, rtol=1e-4), err

    print("KERNEL_OK")
</pallas_src>

<mosaic_0001>
module attributes {stable_mosaic.version = 11 : i64} {
  func.func @_fused_dsconv_bn_relu_kernel(%arg0: memref<8x256xf32, #tpu.memory_space<vmem>>, %arg1: memref<8x9xf32, #tpu.memory_space<vmem>>, %arg2: memref<8x4xf32, #tpu.memory_space<vmem>>, %arg3: memref<8x1xf32, #tpu.memory_space<vmem>>, %arg4: memref<8x1xf32, #tpu.memory_space<vmem>>, %arg5: memref<8x1xf32, #tpu.memory_space<vmem>>, %arg6: memref<2x8x256xf32, #tpu.memory_space<vmem>>) attributes {dimension_semantics = [], scalar_prefetch = 0 : i64, scratch_operands = 0 : i64, tpu.core_type = #tpu.core_type<tc>} {
    %c0 = arith.constant 0 : index
    %c0_0 = arith.constant 0 : index
    %0 = vector.load %arg0[%c0, %c0_0] : memref<8x256xf32, #tpu.memory_space<vmem>>, vector<8x256xf32>
    %c0_1 = arith.constant 0 : index
    %c0_2 = arith.constant 0 : index
    %1 = vector.load %arg1[%c0_1, %c0_2] : memref<8x9xf32, #tpu.memory_space<vmem>>, vector<8x9xf32>
    %c0_3 = arith.constant 0 : index
    %c0_4 = arith.constant 0 : index
    %2 = vector.load %arg2[%c0_3, %c0_4] : memref<8x4xf32, #tpu.memory_space<vmem>>, vector<8x4xf32>
    %c0_5 = arith.constant 0 : index
    %c0_6 = arith.constant 0 : index
    %3 = vector.load %arg3[%c0_5, %c0_6] : memref<8x1xf32, #tpu.memory_space<vmem>>, vector<8x1xf32>
    %4 = vector.extract_strided_slice %1 {offsets = [0, 0], sizes = [8, 1], strides = [1, 1]} : vector<8x9xf32> to vector<8x1xf32>
    %5 = vector.broadcast %4 : vector<8x1xf32> to vector<8x256xf32>
    %6 = arith.mulf %0, %5 : vector<8x256xf32>
    %c255_i32 = arith.constant 255 : i32
    %7 = tpu.dynamic_rotate %0 by %c255_i32 dim 1 : vector<8x256xf32>, i32 -> vector<8x256xf32>
    %8 = vector.extract_strided_slice %1 {offsets = [0, 1], sizes = [8, 1], strides = [1, 1]} : vector<8x9xf32> to vector<8x1xf32>
    %9 = vector.broadcast %8 : vector<8x1xf32> to vector<8x256xf32>
    %10 = arith.mulf %7, %9 : vector<8x256xf32>
    %11 = arith.addf %6, %10 : vector<8x256xf32>
    %c254_i32 = arith.constant 254 : i32
    %12 = tpu.dynamic_rotate %0 by %c254_i32 dim 1 : vector<8x256xf32>, i32 -> vector<8x256xf32>
    %13 = vector.extract_strided_slice %1 {offsets = [0, 2], sizes = [8, 1], strides = [1, 1]} : vector<8x9xf32> to vector<8x1xf32>
    %14 = vector.broadcast %13 : vector<8x1xf32> to vector<8x256xf32>
    %15 = arith.mulf %12, %14 : vector<8x256xf32>
    %16 = arith.addf %11, %15 : vector<8x256xf32>
    %c240_i32 = arith.constant 240 : i32
    %17 = tpu.dynamic_rotate %0 by %c240_i32 dim 1 : vector<8x256xf32>, i32 -> vector<8x256xf32>
    %18 = vector.extract_strided_slice %1 {offsets = [0, 3], sizes = [8, 1], strides = [1, 1]} : vector<8x9xf32> to vector<8x1xf32>
    %19 = vector.broadcast %18 : vector<8x1xf32> to vector<8x256xf32>
    %20 = arith.mulf %17, %19 : vector<8x256xf32>
    %21 = arith.addf %16, %20 : vector<8x256xf32>
    %c239_i32 = arith.constant 239 : i32
    %22 = tpu.dynamic_rotate %0 by %c239_i32 dim 1 : vector<8x256xf32>, i32 -> vector<8x256xf32>
    %23 = vector.extract_strided_slice %1 {offsets = [0, 4], sizes = [8, 1], strides = [1, 1]} : vector<8x9xf32> to vector<8x1xf32>
    %24 = vector.broadcast %23 : vector<8x1xf32> to vector<8x256xf32>
    %25 = arith.mulf %22, %24 : vector<8x256xf32>
    %26 = arith.addf %21, %25 : vector<8x256xf32>
    %c238_i32 = arith.constant 238 : i32
    %27 = tpu.dynamic_rotate %0 by %c238_i32 dim 1 : vector<8x256xf32>, i32 -> vector<8x256xf32>
    %28 = vector.extract_strided_slice %1 {offsets = [0, 5], sizes = [8, 1], strides = [1, 1]} : vector<8x9xf32> to vector<8x1xf32>
    %29 = vector.broadcast %28 : vector<8x1xf32> to vector<8x256xf32>
    %30 = arith.mulf %27, %29 : vector<8x256xf32>
    %31 = arith.addf %26, %30 : vector<8x256xf32>
    %c224_i32 = arith.constant 224 : i32
    %32 = tpu.dynamic_rotate %0 by %c224_i32 dim 1 : vector<8x256xf32>, i32 -> vector<8x256xf32>
    %33 = vector.extract_strided_slice %1 {offsets = [0, 6], sizes = [8, 1], strides = [1, 1]} : vector<8x9xf32> to vector<8x1xf32>
    %34 = vector.broadcast %33 : vector<8x1xf32> to vector<8x256xf32>
    %35 = arith.mulf %32, %34 : vector<8x256xf32>
    %36 = arith.addf %31, %35 : vector<8x256xf32>
    %c223_i32 = arith.constant 223 : i32
    %37 = tpu.dynamic_rotate %0 by %c223_i32 dim 1 : vector<8x256xf32>, i32 -> vector<8x256xf32>
    %38 = vector.extract_strided_slice %1 {offsets = [0, 7], sizes = [8, 1], strides = [1, 1]} : vector<8x9xf32> to vector<8x1xf32>
    %39 = vector.broadcast %38 : vector<8x1xf32> to vector<8x256xf32>
    %40 = arith.mulf %37, %39 : vector<8x256xf32>
    %41 = arith.addf %36, %40 : vector<8x256xf32>
    %c222_i32 = arith.constant 222 : i32
    %42 = tpu.dynamic_rotate %0 by %c222_i32 dim 1 : vector<8x256xf32>, i32 -> vector<8x256xf32>
    %43 = vector.extract_strided_slice %1 {offsets = [0, 8], sizes = [8, 1], strides = [1, 1]} : vector<8x9xf32> to vector<8x1xf32>
    %44 = vector.broadcast %43 : vector<8x1xf32> to vector<8x256xf32>
    %45 = arith.mulf %42, %44 : vector<8x256xf32>
    %46 = arith.addf %41, %45 : vector<8x256xf32>
    %47 = tpu.iota {dimensions = array<i32: 1>} : vector<1x256xi32>
    %c224_i32_7 = arith.constant 224 : i32
    %48 = vector.broadcast %c224_i32_7 : i32 to vector<1x256xi32>
    %49 = arith.cmpi slt, %47, %48 : vector<1x256xi32>
    %c16_i32 = arith.constant 16 : i32
    %c0_i32 = arith.constant 0 : i32
    %50 = arith.cmpi eq, %c16_i32, %c0_i32 : i32
    %c1_i32 = arith.constant 1 : i32
    %51 = arith.select %50, %c1_i32, %c16_i32 : i32
    %52 = vector.broadcast %51 : i32 to vector<1x256xi32>
    %53 = arith.remsi %47, %52 : vector<1x256xi32>
    %c0_i32_8 = arith.constant 0 : i32
    %54 = vector.broadcast %c0_i32_8 : i32 to vector<1x256xi32>
    %55 = arith.cmpi ne, %53, %54 : vector<1x256xi32>
    %c0_i32_9 = arith.constant 0 : i32
    %56 = vector.broadcast %c0_i32_9 : i32 to vector<1x256xi32>
    %57 = arith.cmpi slt, %53, %56 : vector<1x256xi32>
    %c0_i32_10 = arith.constant 0 : i32
    %58 = arith.cmpi slt, %51, %c0_i32_10 : i32
    %59 = vector.broadcast %58 : i1 to vector<1x256xi1>
    %60 = vector.broadcast %59 : vector<1x256xi1> to vector<1x256xi1>
    %61 = arith.xori %57, %60 : vector<1x256xi1>
    %62 = arith.andi %61, %55 : vector<1x256xi1>
    %63 = vector.broadcast %51 : i32 to vector<1x256xi32>
    %64 = arith.addi %53, %63 : vector<1x256xi32>
    %65 = arith.select %62, %64, %53 : vector<1x256xi1>, vector<1x256xi32>
    %c14_i32 = arith.constant 14 : i32
    %66 = vector.broadcast %c14_i32 : i32 to vector<1x256xi32>
    %67 = arith.cmpi slt, %65, %66 : vector<1x256xi32>
    %68 = arith.andi %49, %67 : vector<1x256xi1>
    %69 = arith.extui %68 : vector<1x256xi1> to vector<1x256xi32>
    %70 = arith.sitofp %69 : vector<1x256xi32> to vector<1x256xf32>
    %cst = arith.constant 0.000000e+00 : f32
    %71 = vector.broadcast %cst : f32 to vector<8x1xf32>
    %cst_11 = arith.constant 0.000000e+00 : f32
    %72 = vector.broadcast %cst_11 : f32 to vector<8x1xf32>
    %73 = vector.extract_strided_slice %46 {offsets = [0, 0], sizes = [1, 256], strides = [1, 1]} : vector<8x256xf32> to vector<1x256xf32>
    %74 = vector.extract_strided_slice %2 {offsets = [0, 0], sizes = [8, 1], strides = [1, 1]} : vector<8x4xf32> to vector<8x1xf32>
    %75 = vector.broadcast %73 : vector<1x256xf32> to vector<8x256xf32>
    %76 = vector.broadcast %74 : vector<8x1xf32> to vector<8x256xf32>
    %77 = arith.mulf %75, %76 : vector<8x256xf32>
    %78 = vector.broadcast %3 : vector<8x1xf32> to vector<8x256xf32>
    %79 = arith.addf %78, %77 : vector<8x256xf32>
    %80 = vector.extract_strided_slice %46 {offsets = [1, 0], sizes = [1, 256], strides = [1, 1]} : vector<8x256xf32> to vector<1x256xf32>
    %81 = vector.extract_strided_slice %2 {offsets = [0, 1], sizes = [8, 1], strides = [1, 1]} : vector<8x4xf32> to vector<8x1xf32>
    %82 = vector.broadcast %80 : vector<1x256xf32> to vector<8x256xf32>
    %83 = vector.broadcast %81 : vector<8x1xf32> to vector<8x256xf32>
    %84 = arith.mulf %82, %83 : vector<8x256xf32>
    %85 = arith.addf %79, %84 : vector<8x256xf32>
    %86 = vector.extract_strided_slice %46 {offsets = [2, 0], sizes = [1, 256], strides = [1, 1]} : vector<8x256xf32> to vector<1x256xf32>
    %87 = vector.extract_strided_slice %2 {offsets = [0, 2], sizes = [8, 1], strides = [1, 1]} : vector<8x4xf32> to vector<8x1xf32>
    %88 = vector.broadcast %86 : vector<1x256xf32> to vector<8x256xf32>
    %89 = vector.broadcast %87 : vector<8x1xf32> to vector<8x256xf32>
    %90 = arith.mulf %88, %89 : vector<8x256xf32>
    %91 = arith.addf %85, %90 : vector<8x256xf32>
    %92 = vector.extract_strided_slice %46 {offsets = [3, 0], sizes = [1, 256], strides = [1, 1]} : vector<8x256xf32> to vector<1x256xf32>
    %93 = vector.extract_strided_slice %2 {offsets = [0, 3], sizes = [8, 1], strides = [1, 1]} : vector<8x4xf32> to vector<8x1xf32>
    %94 = vector.broadcast %92 : vector<1x256xf32> to vector<8x256xf32>
    %95 = vector.broadcast %93 : vector<8x1xf32> to vector<8x256xf32>
    %96 = arith.mulf %94, %95 : vector<8x256xf32>
    %97 = arith.addf %91, %96 : vector<8x256xf32>
    %98 = vector.broadcast %70 : vector<1x256xf32> to vector<8x256xf32>
    %99 = arith.mulf %97, %98 : vector<8x256xf32>
    %cst_12 = arith.constant dense<0.000000e+00> : vector<8xf32>
    %100 = vector.multi_reduction <add>, %99, %cst_12 [1] : vector<8x256xf32> to vector<8xf32>
    %101 = vector.shape_cast %100 : vector<8xf32> to vector<8x1xf32>
    %102 = arith.addf %71, %101 : vector<8x1xf32>
    %103 = arith.mulf %99, %99 : vector<8x256xf32>
    %cst_13 = arith.constant dense<0.000000e+00> : vector<8xf32>
    %104 = vector.multi_reduction <add>, %103, %cst_13 [1] : vector<8x256xf32> to vector<8xf32>
    %105 = vector.shape_cast %104 : vector<8xf32> to vector<8x1xf32>
    %106 = arith.addf %72, %105 : vector<8x1xf32>
    %107 = vector.extract_strided_slice %46 {offsets = [4, 0], sizes = [1, 256], strides = [1, 1]} : vector<8x256xf32> to vector<1x256xf32>
    %108 = vector.extract_strided_slice %2 {offsets = [0, 0], sizes = [8, 1], strides = [1, 1]} : vector<8x4xf32> to vector<8x1xf32>
    %109 = vector.broadcast %107 : vector<1x256xf32> to vector<8x256xf32>
    %110 = vector.broadcast %108 : vector<8x1xf32> to vector<8x256xf32>
    %111 = arith.mulf %109, %110 : vector<8x256xf32>
    %112 = vector.broadcast %3 : vector<8x1xf32> to vector<8x256xf32>
    %113 = arith.addf %112, %111 : vector<8x256xf32>
    %114 = vector.extract_strided_slice %46 {offsets = [5, 0], sizes = [1, 256], strides = [1, 1]} : vector<8x256xf32> to vector<1x256xf32>
    %115 = vector.extract_strided_slice %2 {offsets = [0, 1], sizes = [8, 1], strides = [1, 1]} : vector<8x4xf32> to vector<8x1xf32>
    %116 = vector.broadcast %114 : vector<1x256xf32> to vector<8x256xf32>
    %117 = vector.broadcast %115 : vector<8x1xf32> to vector<8x256xf32>
    %118 = arith.mulf %116, %117 : vector<8x256xf32>
    %119 = arith.addf %113, %118 : vector<8x256xf32>
    %120 = vector.extract_strided_slice %46 {offsets = [6, 0], sizes = [1, 256], strides = [1, 1]} : vector<8x256xf32> to vector<1x256xf32>
    %121 = vector.extract_strided_slice %2 {offsets = [0, 2], sizes = [8, 1], strides = [1, 1]} : vector<8x4xf32> to vector<8x1xf32>
    %122 = vector.broadcast %120 : vector<1x256xf32> to vector<8x256xf32>
    %123 = vector.broadcast %121 : vector<8x1xf32> to vector<8x256xf32>
    %124 = arith.mulf %122, %123 : vector<8x256xf32>
    %125 = arith.addf %119, %124 : vector<8x256xf32>
    %126 = vector.extract_strided_slice %46 {offsets = [7, 0], sizes = [1, 256], strides = [1, 1]} : vector<8x256xf32> to vector<1x256xf32>
    %127 = vector.extract_strided_slice %2 {offsets = [0, 3], sizes = [8, 1], strides = [1, 1]} : vector<8x4xf32> to vector<8x1xf32>
    %128 = vector.broadcast %126 : vector<1x256xf32> to vector<8x256xf32>
    %129 = vector.broadcast %127 : vector<8x1xf32> to vector<8x256xf32>
    %130 = arith.mulf %128, %129 : vector<8x256xf32>
    %131 = arith.addf %125, %130 : vector<8x256xf32>
    %132 = vector.broadcast %70 : vector<1x256xf32> to vector<8x256xf32>
    %133 = arith.mulf %131, %132 : vector<8x256xf32>
    %cst_14 = arith.constant dense<0.000000e+00> : vector<8xf32>
    %134 = vector.multi_reduction <add>, %133, %cst_14 [1] : vector<8x256xf32> to vector<8xf32>
    %135 = vector.shape_cast %134 : vector<8xf32> to vector<8x1xf32>
    %136 = arith.addf %102, %135 : vector<8x1xf32>
    %137 = arith.mulf %133, %133 : vector<8x256xf32>
    %cst_15 = arith.constant dense<0.000000e+00> : vector<8xf32>
    %138 = vector.multi_reduction <add>, %137, %cst_15 [1] : vector<8x256xf32> to vector<8xf32>
    %139 = vector.shape_cast %138 : vector<8xf32> to vector<8x1xf32>
    %140 = arith.addf %106, %139 : vector<8x1xf32>
    %cst_16 = arith.constant 0.00255102036 : f32
    %141 = vector.broadcast %cst_16 : f32 to vector<8x1xf32>
    %142 = arith.mulf %136, %141 : vector<8x1xf32>
    %cst_17 = arith.constant 0.00255102036 : f32
    %143 = vector.broadcast %cst_17 : f32 to vector<8x1xf32>
    %144 = arith.mulf %140, %143 : vector<8x1xf32>
    %145 = arith.mulf %142, %142 : vector<8x1xf32>
    %146 = arith.subf %144, %145 : vector<8x1xf32>
    %cst_18 = arith.constant 9.99999974E-6 : f32
    %147 = vector.broadcast %cst_18 : f32 to vector<8x1xf32>
    %148 = arith.addf %146, %147 : vector<8x1xf32>
    %149 = math.rsqrt %148 : vector<8x1xf32>
    %c0_19 = arith.constant 0 : index
    %c0_20 = arith.constant 0 : index
    %150 = vector.load %arg4[%c0_19, %c0_20] : memref<8x1xf32, #tpu.memory_space<vmem>>, vector<8x1xf32>
    %151 = arith.mulf %150, %149 : vector<8x1xf32>
    %c0_21 = arith.constant 0 : index
    %c0_22 = arith.constant 0 : index
    %152 = vector.load %arg5[%c0_21, %c0_22] : memref<8x1xf32, #tpu.memory_space<vmem>>, vector<8x1xf32>
    %153 = arith.mulf %142, %151 : vector<8x1xf32>
    %154 = arith.subf %152, %153 : vector<8x1xf32>
    %155 = vector.broadcast %151 : vector<8x1xf32> to vector<8x256xf32>
    %156 = arith.mulf %97, %155 : vector<8x256xf32>
    %157 = vector.broadcast %154 : vector<8x1xf32> to vector<8x256xf32>
    %158 = arith.addf %156, %157 : vector<8x256xf32>
    %cst_23 = arith.constant 0.000000e+00 : f32
    %159 = vector.broadcast %cst_23 : f32 to vector<8x256xf32>
    %160 = arith.maximumf %158, %159 : vector<8x256xf32>
    %c0_24 = arith.constant 0 : index
    %c0_25 = arith.constant 0 : index
    %c0_26 = arith.constant 0 : index
    %161 = vector.load %arg6[%c0_24, %c0_25, %c0_26] : memref<2x8x256xf32, #tpu.memory_space<vmem>>, vector<1x8x256xf32>
    %162 = vector.shape_cast %161 : vector<1x8x256xf32> to vector<8x256xf32>
    %163 = vector.shape_cast %160 : vector<8x256xf32> to vector<1x8x256xf32>
    tpu.vector_store %arg6[%c0_24, %c0_25, %c0_26], %163 {strides = array<i32>} : memref<2x8x256xf32, #tpu.memory_space<vmem>>, vector<1x8x256xf32>,
    %164 = vector.broadcast %151 : vector<8x1xf32> to vector<8x256xf32>
    %165 = arith.mulf %131, %164 : vector<8x256xf32>
    %166 = vector.broadcast %154 : vector<8x1xf32> to vector<8x256xf32>
    %167 = arith.addf %165, %166 : vector<8x256xf32>
    %cst_27 = arith.constant 0.000000e+00 : f32
    %168 = vector.broadcast %cst_27 : f32 to vector<8x256xf32>
    %169 = arith.maximumf %167, %168 : vector<8x256xf32>
    %c1 = arith.constant 1 : index
    %c0_28 = arith.constant 0 : index
    %c0_29 = arith.constant 0 : index
    %170 = vector.load %arg6[%c1, %c0_28, %c0_29] : memref<2x8x256xf32, #tpu.memory_space<vmem>>, vector<1x8x256xf32>
    %171 = vector.shape_cast %170 : vector<1x8x256xf32> to vector<8x256xf32>
    %172 = vector.shape_cast %169 : vector<8x256xf32> to vector<1x8x256xf32>
    tpu.vector_store %arg6[%c1, %c0_28, %c0_29], %172 {strides = array<i32>} : memref<2x8x256xf32, #tpu.memory_space<vmem>>, vector<1x8x256xf32>,
    return
  }
}

</mosaic_0001>

<bundles_post_ra>
// kernel: tpu_custom_call.1
= control target key start
LH: loop header
LB: loop body
LE: loop exit
PB: predicated region body
PF: predicated region fallthrough
CT: control target
= control target key end

     0   :  { %v454_v1 = vmov 2   ;;  %v455_v2 = vmov 0   ;;  %s605_s0 = inlined_call_operand.vmem [shape: f32[8,256], index: 0, kind: input, shape index: {}]   ;;  %s606_s1 = inlined_call_operand.vmem [shape: f32[8,9], index: 1, kind: input, shape index: {}]   ;;  %s607_s2 = inlined_call_operand.vmem [shape: f32[8,4], index: 2, kind: input, shape index: {}]   ;;  %s608_s3 = inlined_call_operand.vmem [shape: f32[8,1], index: 3, kind: input, shape index: {}]   ;;  %s609_s4 = inlined_call_operand.vmem [shape: f32[8,1], index: 4, kind: input, shape index: {}]   ;;  %s610_s5 = inlined_call_operand.vmem [shape: f32[8,1], index: 5, kind: input, shape index: {}]   ;;  %s611_s6 = inlined_call_operand.hbm [shape: f32[2,8,256], index: 6, kind: output, shape index: {}]  }
   0x1   :  { %v26_v0 = vld [vmem:[%s606_s1] sm:$0xff]  ;;  %414 = vset.pattern.permute.xlu1 %v454_v1  ;;  %412 = vset.pattern.permute.xlu0 %v455_v2 }
   0x2   :  { %61 = vperm.xlu1 %414, %v26_v0   ;;  %31 = vperm.xlu0 %412, %v26_v0  }
   0x3   :  { %11 = vsyncpa [#allocation3], 0  ;;  %v456_v3 = vmov 3   ;;  %v457_v4 = vmov 1   ;;  %v517_v5 = vld [vmem:[%s605_s0] sm:$0xff]  ;;  %v522_v6 = vld [vmem:[%s605_s0 + $0x8] sm:$0xff]  ;;  %v40_v26 = vlaneseq }
   0x4   :  { %s458_s26 = smov 127   ;;  %v459_v7 = vmov 4   ;;  %v460_v8 = vmov 5   ;;  %s461_s27 = smov 126   ;;  %v463_v9 = vmov 6   ;;  %v464_v10 = vmov 7  }
   0x5   :  { %s462_s0 = smov 112   ;;  %s465_s28 = smov 111   ;;  %v466_v11 = vmov 8   ;;  %v27_v12 = vld [vmem:[%s607_s2] sm:$0xff]  ;;  %v550_v29 = vand.u32 127, %v40_v26 }
   0x6   :  { %415 = vset.pattern.permute.xlu1 %v456_v3  ;;  %413 = vset.pattern.permute.xlu0 %v457_v4  ;;  %s467_s29 = smov 95   ;;  %s468_s30 = smov 110   ;;  %v28_v13 = vld [vmem:[%s608_s3] sm:$0xff] }
   0x7   :  { %76 = vperm.xlu1 %415, %v26_v0   ;;  %46 = vperm.xlu0 %413, %v26_v0   ;;  %s469_s7 = smov 94   ;;  %s470_s10 = smov 96   ;;  %vm42_vm0 = vcmp.lt.s32.totalorder %v550_v29, 127  ;;  %vm57_vm1 = vcmp.lt.s32.totalorder %v550_v29, 126  ;;  %vm72_vm2 = vcmp.lt.s32.totalorder %v550_v29, 112  ;;  %vm87_vm3 = vcmp.lt.s32.totalorder %v550_v29, 111 }
   0x8   :  { %vm102_vm4 = vcmp.lt.s32.totalorder %v550_v29, 110  ;;  %vm117_vm5 = vcmp.lt.s32.totalorder %v550_v29, 96  ;;  %vm132_vm6 = vcmp.lt.s32.totalorder %v550_v29, 95  ;;  %vm147_vm7 = vcmp.lt.s32.totalorder %v550_v29, 94  ;;  %s472_s15 = smov [#allocation2]  }
   0x9   :  { %s378_s16 = sshll.u32 %s472_s15, 4  ;;  %s379_s16 = int_to_ptr.vmem [resolvable:$true] %s378_s16 }
   0xa   :  { %p435_p1 = scmp.lt.s32.totalorder %s379_s16, %s379_s16 }
   0xb   :  { %36 = vrot.lane.b32.xlu1 %v517_v5, %s458_s26  ;;  %38 = vrot.lane.b32.xlu0 %v522_v6, %s458_s26 }
   0xc   :  { %416 = vset.pattern.permute.xlu1 %v459_v7  ;;  %417 = vset.pattern.permute.xlu0 %v460_v8 }
   0xf   :  { %91 = vperm.xlu1 %416, %v26_v0   ;;  %53 = vrot.lane.b32.xlu0 %v517_v5, %s461_s27 }
  0x13   :  { %55 = vrot.lane.b32.xlu1 %v522_v6, %s461_s27  ;;  %106 = vperm.xlu0 %417, %v26_v0  }
  0x14   :  { %422 = vset.pattern.permute.xlu1 %v455_v2 }
  0x17   :  { %68 = vrot.lane.b32.xlu1 %v517_v5, %s462_s0  ;;  %418 = vset.pattern.permute.xlu0 %v463_v9 }
  0x18   :  { %121 = vperm.xlu0 %418, %v26_v0  }
  0x1b   :  { %70 = vrot.lane.b32.xlu1 %v522_v6, %s462_s0 }
  0x1c   :  { %419 = vset.pattern.permute.xlu0 %v464_v10 }
  0x1d   :  { %136 = vperm.xlu0 %419, %v26_v0  }
  0x1f   :  { %83 = vrot.lane.b32.xlu1 %v517_v5, %s465_s28 }
  0x21   :  { %420 = vset.pattern.permute.xlu0 %v466_v11 }
  0x22   :  { %151 = vperm.xlu0 %420, %v26_v0  }
  0x23   :  { %85 = vrot.lane.b32.xlu1 %v522_v6, %s465_s28 }
  0x26   :  { %128 = vrot.lane.b32.xlu0 %v517_v5, %s467_s29 }
  0x27   :  { %98 = vrot.lane.b32.xlu1 %v517_v5, %s468_s30  ;;  %421 = vset.pattern.permute.xlu0 %v455_v2 }
  0x2a   :  { %143 = vrot.lane.b32.xlu0 %v517_v5, %s469_s7 }
  0x2b   :  { %100 = vrot.lane.b32.xlu1 %v522_v6, %s468_s30 }
  0x2e   :  { %203 = vperm.xlu0 %421, %v27_v12  }
  0x2f   :  { %113 = vrot.lane.b32.xlu1 %v517_v5, %s470_s10 }
  0x32   :  { %424 = vset.pattern.permute.xlu0 %v454_v1 }
  0x33   :  { %115 = vrot.lane.b32.xlu1 %v522_v6, %s470_s10  ;;  %240 = vperm.xlu0 %424, %v27_v12  }
  0x37   :  { %130 = vrot.lane.b32.xlu1 %v522_v6, %s467_s29  ;;  %426 = vset.pattern.permute.xlu0 %v455_v2 }
  0x3b   :  { %145 = vrot.lane.b32.xlu1 %v522_v6, %s469_s7 }
  0x3f   :  { %210 = vperm.xlu1 %422, %v28_v13  }
  0x43   :  { %423 = vset.pattern.permute.xlu1 %v457_v4  ;;  %v561_v4 = vshrl.u32 %v40_v26, 7 }
  0x44   :  { %224 = vperm.xlu1 %423, %v27_v12  }
  0x48   :  { %425 = vset.pattern.permute.xlu1 %v456_v3 }
  0x49   :  { %256 = vperm.xlu1 %425, %v27_v12  }
  0x4d   :  { %427 = vset.pattern.permute.xlu1 %v455_v2 }
  0x81   :  { %v62_v14 = vpop.permute.xlu1 %61  ;;  %v32_v16 = vpop.permute.xlu0 %31 }
  0x82   :  { %v34_v38 = vmul.f32 %v32_v16, %v517_v5  ;;  %v35_v39 = vmul.f32 %v32_v16, %v522_v6 }
  0x86   :  { %v77_v15 = vpop.permute.xlu1 %76  ;;  %v47_v18 = vpop.permute.xlu0 %46 }
  0x8a   :  { %v37_v17 = vpop.permute.xlu1 %36  ;;  %v39_v21 = vpop.permute.xlu0 %38 }
  0x8b   :  { %v43_v33 = vsel %vm42_vm0, %v37_v17, %v39_v21  ;;  %v44_v34 = vsel %vm42_vm0, %v39_v21, %v37_v17 }
  0x8c   :  { %v49_v40 = vmul.f32 %v47_v18, %v43_v33  ;;  %v50_v41 = vmul.f32 %v47_v18, %v44_v34 }
  0x8e   :  { %v92_v19 = vpop.permute.xlu1 %91  ;;  %v54_v23 = vpop.permute.xlu0 %53  ;;  %v51_v50 = vadd.f32 %v49_v40, %v34_v38  ;;  %v52_v51 = vadd.f32 %v50_v41, %v35_v39  ;;  %v249_v38 = vsub.s32 3, %v561_v4  ;;  %v313_v39 = vsub.s32 7, %v561_v4 }
  0x8f   :  { %v165_v40 = vand.u32 15, %v550_v29 }
  0x91   :  { %vm574_vm9 = vcmp.lt.s32.totalorder %v165_v40, 14 }
  0x92   :  { %v56_v20 = vpop.permute.xlu1 %55  ;;  %v107_v25 = vpop.permute.xlu0 %106 }
  0x93   :  { %v58_v36 = vsel %vm57_vm1, %v54_v23, %v56_v20  ;;  %v59_v37 = vsel %vm57_vm1, %v56_v20, %v54_v23  ;;  %v195_v20 = vsub.s32 0, %v561_v4  ;;  %v277_v23 = vsub.s32 4, %v561_v4 }
  0x94   :  { %v64_v45 = vmul.f32 %v62_v14, %v58_v36  ;;  %v65_v46 = vmul.f32 %v62_v14, %v59_v37  ;;  %v217_v36 = vsub.s32 1, %v561_v4  ;;  %v289_v37 = vsub.s32 5, %v561_v4 }
  0x96   :  { %v69_v22 = vpop.permute.xlu1 %68  ;;  %v66_v56 = vadd.f32 %v64_v45, %v51_v50  ;;  %v67_v57 = vadd.f32 %v65_v46, %v52_v51 }
  0x97   :  { %v122_v28 = vpop.permute.xlu0 %121 }
  0x9a   :  { %v71_v24 = vpop.permute.xlu1 %70 }
  0x9b   :  { %v73_v42 = vsel %vm72_vm2, %v69_v22, %v71_v24  ;;  %v74_v43 = vsel %vm72_vm2, %v71_v24, %v69_v22  ;;  %v158_v24 = vadd.s32 128, %v550_v29  ;;  %v341_v29 = vld [vmem:[%s609_s4] sm:$0xff]  ;;  %s430_s4 = scalar_lea.vmem %s379_s16, 512 }
  0x9c   :  { %v137_v32 = vpop.permute.xlu0 %136  ;;  %v79_v52 = vmul.f32 %v77_v15, %v73_v42  ;;  %v80_v53 = vmul.f32 %v77_v15, %v74_v43  ;;  %p431_p0 = scmp.ne.s32.totalorder %s379_s16, %s430_s4  ;;  %p436_p2 = scmp.lt.s32.totalorder %s430_s4, %s430_s4 }
  0x9d   :  { %v172_v41 = vand.u32 15, %v158_v24  ;;  %vm160_vm8 = vcmp.lt.s32.totalorder %v158_v24, 224 }
  0x9e   :  { %v84_v27 = vpop.permute.xlu1 %83  ;;  %v81_v0 = vadd.f32 %v79_v52, %v66_v56  ;;  %v82_v1 = vadd.f32 %v80_v53, %v67_v57  ;;  %p437_p3 = por %p436_p2, %p435_p1 }
  0x9f   :  { %vm578_vm10 = vcmp.lt.s32.totalorder %v172_v41, 14 }
  0xa0   :  { %vm188_vm11 = vmand %vm160_vm8, %vm578_vm10  ;;  %p438_p4 = pnand %p437_p3, %p431_p0 }
  0xa1   :  { %v152_v44 = vpop.permute.xlu0 %151 }
  0xa2   :  { %v86_v30 = vpop.permute.xlu1 %85 }
  0xa3   :  { %v88_v48 = vsel %vm87_vm3, %v84_v27, %v86_v30  ;;  %v89_v49 = vsel %vm87_vm3, %v86_v30, %v84_v27 }
  0xa4   :  { %v94_v58 = vmul.f32 %v92_v19, %v88_v48  ;;  %v95_v59 = vmul.f32 %v92_v19, %v89_v49 }
  0xa5   :  { %v129_v61 = vpop.permute.xlu0 %128 }
  0xa6   :  { %v99_v31 = vpop.permute.xlu1 %98  ;;  %v96_v5 = vadd.f32 %v94_v58, %v81_v0  ;;  %v97_v6 = vadd.f32 %v95_v59, %v82_v1 }
  0xa9   :  { %v144_v16 = vpop.permute.xlu0 %143 }
  0xaa   :  { %v101_v35 = vpop.permute.xlu1 %100 }
  0xab   :  { %v103_v54 = vsel %vm102_vm4, %v99_v31, %v101_v35  ;;  %v104_v55 = vsel %vm102_vm4, %v101_v35, %v99_v31  ;;  %v233_v31 = vsub.s32 2, %v561_v4 }
  0xac   :  { %v109_v2 = vmul.f32 %v107_v25, %v103_v54  ;;  %v110_v3 = vmul.f32 %v107_v25, %v104_v55 }
  0xad   :  { %v204_v30 = vpop.permute.xlu0 %203 }
  0xae   :  { %v114_v47 = vpop.permute.xlu1 %113  ;;  %v111_v12 = vadd.f32 %v109_v2, %v96_v5  ;;  %v112_v13 = vadd.f32 %v110_v3, %v97_v6 }
  0xb2   :  { %v116_v60 = vpop.permute.xlu1 %115  ;;  %v241_v54 = vpop.permute.xlu0 %240 }
  0xb3   :  { %v118_v62 = vsel %vm117_vm5, %v114_v47, %v116_v60  ;;  %v119_v63 = vsel %vm117_vm5, %v116_v60, %v114_v47 }
  0xb4   :  { %v124_v7 = vmul.f32 %v122_v28, %v118_v62  ;;  %v125_v8 = vmul.f32 %v122_v28, %v119_v63 }
  0xb6   :  { %v131_v9 = vpop.permute.xlu1 %130  ;;  %v126_v17 = vadd.f32 %v124_v7, %v111_v12  ;;  %v127_v18 = vadd.f32 %v125_v8, %v112_v13 }
  0xb7   :  { %v133_v10 = vsel %vm132_vm6, %v129_v61, %v131_v9  ;;  %v134_v11 = vsel %vm132_vm6, %v131_v9, %v129_v61 }
  0xb8   :  { %v139_v14 = vmul.f32 %v137_v32, %v133_v10  ;;  %v140_v15 = vmul.f32 %v137_v32, %v134_v11  ;;  %v301_v32 = vsub.s32 6, %v561_v4 }
  0xba   :  { %v146_v19 = vpop.permute.xlu1 %145  ;;  %v141_v25 = vadd.f32 %v139_v14, %v126_v17  ;;  %v142_v26 = vadd.f32 %v140_v15, %v127_v18 }
  0xbb   :  { %v148_v21 = vsel %vm147_vm7, %v144_v16, %v146_v19  ;;  %v149_v22 = vsel %vm147_vm7, %v146_v19, %v144_v16 }
  0xbc   :  { %v154_v27 = vmul.f32 %v152_v44, %v148_v21  ;;  %v155_v28 = vmul.f32 %v152_v44, %v149_v22 }
  0xbe   :  { %v156_v33 = vadd.f32 %v154_v27, %v141_v25  ;;  %v157_v34 = vadd.f32 %v155_v28, %v142_v26  ;;  %v211_v35 = vpop.permute.xlu1 %210  ;;  %v471_v27 = vmov 0.0  }
  0xbf   :  { %v389_v28 = vsel %vm574_vm9, 1.0, %v471_v27 }
  0xc0   :  { %v196_v42 = vrot.slane %v156_v33, %v195_v20  ;;  %v200_v43 = vrot.slane %v157_v34, %v195_v20  ;;  %v278_v44 = vrot.slane %v156_v33, %v277_v23  ;;  %v282_v45 = vrot.slane %v157_v34, %v277_v23 }
  0xc1   :  { %v234_v46 = vrot.slane %v156_v33, %v233_v31  ;;  %v238_v47 = vrot.slane %v157_v34, %v233_v31  ;;  %v302_v48 = vrot.slane %v156_v33, %v301_v32  ;;  %v306_v49 = vrot.slane %v157_v34, %v301_v32 }
  0xc2   :  { %v206_v50 = vmul.f32 %v204_v30, %v196_v42  ;;  %v207_v51 = vmul.f32 %v204_v30, %v200_v43  ;;  %v283_v52 = vmul.f32 %v278_v44, %v204_v30  ;;  %v284_v53 = vmul.f32 %v282_v45, %v204_v30 }
  0xc3   :  { %v225_v55 = vpop.permute.xlu1 %224  ;;  %v222_v61 = vrot.slane %v157_v34, %v217_v36  ;;  %v294_v62 = vrot.slane %v157_v34, %v289_v37  ;;  %v218_v63 = vrot.slane %v156_v33, %v217_v36  ;;  %v290_v0 = vrot.slane %v156_v33, %v289_v37 }
  0xc4   :  { %v213_v57 = vadd.f32 %v211_v35, %v206_v50  ;;  %v214_v58 = vadd.f32 %v211_v35, %v207_v51  ;;  %v285_v59 = vadd.f32 %v283_v52, %v211_v35  ;;  %v286_v60 = vadd.f32 %v284_v53, %v211_v35 }
  0xc5   :  { %v243_v1 = vmul.f32 %v241_v54, %v234_v46  ;;  %v244_v2 = vmul.f32 %v241_v54, %v238_v47  ;;  %v307_v3 = vmul.f32 %v302_v48, %v241_v54  ;;  %v308_v4 = vmul.f32 %v306_v49, %v241_v54 }
  0xc6   :  { %v227_v5 = vmul.f32 %v225_v55, %v218_v63  ;;  %v228_v6 = vmul.f32 %v225_v55, %v222_v61  ;;  %v295_v7 = vmul.f32 %v290_v0, %v225_v55  ;;  %v296_v8 = vmul.f32 %v294_v62, %v225_v55 }
  0xc7   :  { %v254_v9 = vrot.slane %v157_v34, %v249_v38  ;;  %v318_v10 = vrot.slane %v157_v34, %v313_v39  ;;  %v250_v12 = vrot.slane %v156_v33, %v249_v38  ;;  %v314_v13 = vrot.slane %v156_v33, %v313_v39 }
  0xc8   :  { %v257_v11 = vpop.permute.xlu1 %256  ;;  %v229_v14 = vadd.f32 %v227_v5, %v213_v57  ;;  %v230_v15 = vadd.f32 %v228_v6, %v214_v58  ;;  %v297_v16 = vadd.f32 %v295_v7, %v285_v59  ;;  %v298_v17 = vadd.f32 %v296_v8, %v286_v60  ;;  %v343_v59 = vld [vmem:[%s610_s5] sm:$0xff] }
  0xc9   :  { %v259_v18 = vmul.f32 %v257_v11, %v250_v12  ;;  %v260_v19 = vmul.f32 %v257_v11, %v254_v9  ;;  %v319_v20 = vmul.f32 %v314_v13, %v257_v11  ;;  %v320_v21 = vmul.f32 %v318_v10, %v257_v11 }
  0xca   :  { %v309_v22 = vadd.f32 %v307_v3, %v297_v16  ;;  %v310_v23 = vadd.f32 %v308_v4, %v298_v17  ;;  %v245_v25 = vadd.f32 %v243_v1, %v229_v14  ;;  %v246_v26 = vadd.f32 %v244_v2, %v230_v15 }
  0xcb   :  { %v390_v30 = vsel %vm188_vm11, 1.0, %v471_v27 }
  0xcc   :  { %v321_v31 = vadd.f32 %v319_v20, %v309_v22  ;;  %v322_v32 = vadd.f32 %v320_v21, %v310_v23  ;;  %v261_v33 = vadd.f32 %v259_v18, %v245_v25  ;;  %v262_v34 = vadd.f32 %v260_v19, %v246_v26 }
  0xce   :  { %v323_v35 = vmul.f32 %v389_v28, %v321_v31  ;;  %v324_v24 = vmul.f32 %v390_v30, %v322_v32  ;;  %v263_v36 = vmul.f32 %v389_v28, %v261_v33  ;;  %v264_v37 = vmul.f32 %v390_v30, %v262_v34 }
  0xd0   :  { %v325_v38 = vadd.f32 %v324_v24, %v323_v35  ;;  %v265_v39 = vadd.f32 %v264_v37, %v263_v36  ;;  %v269_v40 = vmul.f32 %v263_v36, %v263_v36  ;;  %v270_v41 = vmul.f32 %v264_v37, %v264_v37 }
  0xd1   :  { %v329_v42 = vmul.f32 %v323_v35, %v323_v35  ;;  %v330_v43 = vmul.f32 %v324_v24, %v324_v24 }
  0xd2   :  { %326 = vadd.xlane.f32.xlu0 %v325_v38  ;;  %266 = vadd.xlane.f32.xlu1 %v265_v39  ;;  %v271_v44 = vadd.f32 %v270_v41, %v269_v40 }
  0xd3   :  { %v331_v45 = vadd.f32 %v330_v43, %v329_v42 }
  0xd6   :  { %272 = vadd.xlane.f32.xlu0 %v271_v44  ;;  %332 = vadd.xlane.f32.xlu1 %v331_v45 }
 0x15f   :  { %v327_v46 = vpop.xlane.xlu0 %326  ;;  %v267_v47 = vpop.xlane.xlu1 %266 }
 0x160   :  { %v328_v48 = vadd.f32 %v327_v46, %v267_v47 }
 0x162   :  { %v335_v49 = vmul.f32 0.0025510204, %v328_v48 }
 0x163   :  { %v273_v50 = vpop.xlane.xlu0 %272  ;;  %v333_v51 = vpop.xlane.xlu1 %332 }
 0x164   :  { %v334_v52 = vadd.f32 %v333_v51, %v273_v50  ;;  %v337_v53 = vmul.f32 %v335_v49, %v335_v49 }
 0x166   :  { %v336_v54 = vmul.f32 0.0025510204, %v334_v52 }
 0x168   :  { %v338_v55 = vsub.f32 %v336_v54, %v337_v53 }
 0x16a   :  { %v339_v56 = vadd.f32 1e-05, %v338_v55 }
 0x16c   :  { %428 = vrsqrt.f32 %v339_v56 }
 0x176   :  { %v429_v57 = vpop.eup %428 }
 0x177   :  { %v342_v58 = vmul.f32 %v429_v57, %v341_v29 }
 0x179   :  { %348 = vperm.xlu0 %426, %v342_v58   ;;  %v344_v60 = vmul.f32 %v342_v58, %v335_v49 }
 0x17b   :  { %v345_v61 = vsub.f32 %v343_v59, %v344_v60 }
 0x17d   :  { %355 = vperm.xlu1 %427, %v345_v61  }
 0x1f8   :  { %v349_v62 = vpop.permute.xlu0 %348 }
 0x1f9   :  { %v351_v63 = vmul.f32 %v349_v62, %v261_v33  ;;  %v352_v0 = vmul.f32 %v349_v62, %v262_v34  ;;  %v364_v1 = vmul.f32 %v349_v62, %v321_v31  ;;  %v365_v2 = vmul.f32 %v349_v62, %v322_v32 }
 0x1fc   :  { %v356_v3 = vpop.permute.xlu1 %355 }
 0x1fd   :  { %v358_v4 = vadd.f32 %v356_v3, %v351_v63  ;;  %v359_v5 = vadd.f32 %v356_v3, %v352_v0  ;;  %v366_v6 = vadd.f32 %v364_v1, %v356_v3  ;;  %v367_v7 = vadd.f32 %v365_v2, %v356_v3 }
 0x1ff   :  { %v360_v8 = vmax.f32 %v358_v4, 0.0  ;;  %v361_v9 = vmax.f32 %v359_v5, 0.0  ;;  %v368_v10 = vmax.f32 %v366_v6, 0.0  ;;  %v369_v11 = vmax.f32 %v367_v7, 0.0 }
 0x201   :  { %362 = vst [vmem:[#allocation2] sm:$0xff] %v360_v8  ;;  %363 = vst [vmem:[#allocation2 + $0x8] sm:$0xff] %v361_v9 }
 0x202   :  { %371 = vst [vmem:[#allocation2 + $0x10] sm:$0xff] %v368_v10  ;;  %372 = vst [vmem:[#allocation2 + $0x18] sm:$0xff] %v369_v11 }
 0x203   :  { %441 = shalt.err (!%p438_p4)
}
 0x204   :  { %s442_s18 = scalar_lea.hbm %s611_s6, 512 }
 0x205   :  { %p443_p5 = scmp.ne.s32.totalorder %s611_s6, %s442_s18  ;;  %p446_p6 = scmp.lt.u32.totalorder %s442_s18, %s611_s6 }
 0x207   :  { %p448_p7 = pnand %p446_p6, %p443_p5 }
 0x209   :  { %451 = shalt.err (!%p448_p7)
}
 0x20a   :  { %s473_s23 = smov 256   ;;  %s474_s24 = smov 16  }
 0x20b   :  { %384 = dma.vmem_to_hbm [thread:$0]  %s379_s16, 512, %s611_s6, [#allocation3], %s473_s23, %s473_s23, %s474_s24  }
 0x20c   :  { %452 = dma.done.wait [#allocation3], 512  }
 0x20d   :  { %453 = vsyncadd [#allocation3], 4294966784 }
 0x20e   :  { %388 = vsyncpa [#allocation3], 1 }

</bundles_post_ra>
